<compile_context>
chip_gen: v7x
topology: tpu7x:2x2x1
jax: 0.10.0
libtpu: 0.0.40
codegen_flags: <defaults>
</compile_context>

<pallas_src>
import functools
import math

import jax
import jax.numpy as jnp
from jax import lax
from jax.experimental import pallas as pl
from jax.experimental.pallas import tpu as pltpu

_MASK_VALUE = -1e30


@functools.lru_cache(maxsize=None)
def _vmem_limit_bytes():
    """~75% of per-core VMEM: 96 MiB on v5e/v6e (128 MiB), 48 MiB on v7x (64 MiB).
    Conservative 48 MiB fallback if the query is unavailable."""
    cap = 64 * 1024 * 1024
    try:
        info = pltpu.get_tpu_info()
        cap = int(getattr(info, "vmem_capacity_bytes", cap) or cap)
    except Exception:
        pass
    return (cap * 3) // 4


def _pick_tile(dim, pref):
    """Largest divisor of `dim` <= pref, preferring lane/sublane-aligned sizes.
    Small dims use the full extent.  (Awkward dims should be padded by callers.)"""
    if dim <= pref:
        return dim
    for align in (128, 8, 1):
        best = 0
        t = align
        while t <= pref:
            if dim % t == 0:
                best = t
            t += align
        if best:
            return best
    return dim


# --------------------------------------------------------------------------
# Tiled linear: out = x @ W + b   (W pre-transposed to (in, out))
# --------------------------------------------------------------------------
def _linear_kernel_fused(x_ref, w_ref, b_ref, o_ref):
    # Single K pass: one MXU run per output tile, bias add fused into the store.
    o_ref[...] = (jnp.dot(x_ref[...], w_ref[...],
                          preferred_element_type=jnp.float32)
                  + b_ref[...]).astype(o_ref.dtype)


def _linear_kernel_acc(x_ref, w_ref, b_ref, o_ref, acc_ref):
    k = pl.program_id(2)

    @pl.when(k == 0)
    def _():
        acc_ref[...] = jnp.zeros_like(acc_ref)

    acc_ref[...] += jnp.dot(x_ref[...], w_ref[...],
                            preferred_element_type=jnp.float32)

    @pl.when(k == pl.num_programs(2) - 1)
    def _():
        o_ref[...] = (acc_ref[...] + b_ref[...]).astype(o_ref.dtype)


def pallas_linear(x2d, w, b, *, out_dtype, tm=256, tn=1024, tk_max=2048):
    M, K = x2d.shape
    K2, N = w.shape
    assert K == K2 and b.shape == (1, N)
    tm = _pick_tile(M, tm)
    tn = _pick_tile(N, tn)
    vmem = _vmem_limit_bytes()

    if K <= tk_max:
        # Fused K: 2-D grid, N outer so the weight tile is resident across the
        # M sweep (weights read once, activations re-read N//tn times).
        return pl.pallas_call(
            _linear_kernel_fused,
            out_shape=jax.ShapeDtypeStruct((M, N), out_dtype),
            grid_spec=pltpu.PrefetchScalarGridSpec(
                num_scalar_prefetch=0,
                grid=(N // tn, M // tm),
                in_specs=[
                    pl.BlockSpec((tm, K), lambda j, i: (i, 0)),
                    pl.BlockSpec((K, tn), lambda j, i: (0, j)),
                    pl.BlockSpec((1, tn), lambda j, i: (0, j)),
                ],
                out_specs=pl.BlockSpec((tm, tn), lambda j, i: (i, j)),
            ),
            compiler_params=pltpu.CompilerParams(
                dimension_semantics=("parallel", "parallel"),
                vmem_limit_bytes=vmem,
            ),
        )(x2d, w, b)

    # Large-K fallback: tiled reduction with f32 VMEM accumulator.
    tk = _pick_tile(K, 512)
    return pl.pallas_call(
        _linear_kernel_acc,
        out_shape=jax.ShapeDtypeStruct((M, N), out_dtype),
        grid_spec=pltpu.PrefetchScalarGridSpec(
            num_scalar_prefetch=0,
            grid=(N // tn, M // tm, K // tk),
            in_specs=[
                pl.BlockSpec((tm, tk), lambda j, i, k: (i, k)),
                pl.BlockSpec((tk, tn), lambda j, i, k: (k, j)),
                pl.BlockSpec((1, tn), lambda j, i, k: (0, j)),
            ],
            out_specs=pl.BlockSpec((tm, tn), lambda j, i, k: (i, j)),
            scratch_shapes=[pltpu.VMEM((tm, tn), jnp.float32)],
        ),
        compiler_params=pltpu.CompilerParams(
            dimension_semantics=("parallel", "parallel", "arbitrary"),
            vmem_limit_bytes=vmem,
        ),
    )(x2d, w, b)


# --------------------------------------------------------------------------
# Flash-style causal attention over (B, q_tile, kv_tile) grid, heads batched.
# --------------------------------------------------------------------------
def _flash_attn_kernel(q_ref, k_ref, v_ref, o_ref, m_sc, l_sc, acc_sc,
                       *, block_t, approx_recip):
    qi = pl.program_id(1)
    ki = pl.program_id(2)

    @pl.when(ki == 0)
    def _():
        m_sc[...] = jnp.full_like(m_sc, _MASK_VALUE)
        l_sc[...] = jnp.zeros_like(l_sc)
        acc_sc[...] = jnp.zeros_like(acc_sc)

    def scores():
        # 1/sqrt(hd) is already folded into the Q projection weights.
        # (H, tq, hd) x (H, tk, hd) -> (H, tq, tk), f32 accumulation on MXU.
        return jnp.einsum('hqd,hkd->hqk', q_ref[...], k_ref[...],
                          preferred_element_type=jnp.float32)

    def update(s):
        m_prev = m_sc[...]
        m_new = jnp.maximum(m_prev, jnp.max(s, axis=-1, keepdims=True))
        alpha = jnp.exp(m_prev - m_new)
        p = jnp.exp(s - m_new)
        l_sc[...] = alpha * l_sc[...] + jnp.sum(p, axis=-1, keepdims=True)
        acc_sc[...] = alpha * acc_sc[...] + jnp.einsum(
            'hqk,hkd->hqd', p.astype(v_ref.dtype), v_ref[...],
            preferred_element_type=jnp.float32)
        m_sc[...] = m_new

    # KV tiles strictly below the diagonal: fully visible, no mask work.
    @pl.when(ki < qi)
    def _():
        update(scores())

    # Diagonal tile: the only place the causal mask is materialized; it is also
    # the last productive KV step for this query tile, so finalize here.
    # Steps with ki > qi do nothing (their K/V DMA is clamped to the diagonal
    # block index in the BlockSpec, so no tile above the diagonal is fetched).
    @pl.when(ki == qi)
    def _():
        row = lax.broadcasted_iota(jnp.int32, (block_t, block_t), 0)
        col = lax.broadcasted_iota(jnp.int32, (block_t, block_t), 1)
        s = jnp.where((row >= col)[None, :, :], scores(), _MASK_VALUE)
        update(s)
        inv_l = pl.reciprocal(l_sc[...], approx=approx_recip)
        o_ref[...] = (acc_sc[...] * inv_l).astype(o_ref.dtype)


def flash_causal_attention(q, k, v, *, block_t=256, approx_recip=False):
    B, H, T, hd = q.shape
    bt = _pick_tile(T, block_t)
    n_t = T // bt
    kernel = functools.partial(_flash_attn_kernel, block_t=bt,
                               approx_recip=approx_recip)

    q_spec = pl.BlockSpec((None, H, bt, hd), lambda b, i, j: (b, 0, i, 0))
    # Clamp the K/V block index to the diagonal so upper-triangular tiles are
    # never DMA'd (repeat index => Pallas elides the refetch).
    kv_spec = pl.BlockSpec((None, H, bt, hd),
                           lambda b, i, j: (b, 0, jnp.minimum(i, j), 0))

    return pl.pallas_call(
        kernel,
        out_shape=jax.ShapeDtypeStruct((B, H, T, hd), q.dtype),
        grid_spec=pltpu.PrefetchScalarGridSpec(
            num_scalar_prefetch=0,
            grid=(B, n_t, n_t),
            in_specs=[q_spec, kv_spec, kv_spec],
            out_specs=pl.BlockSpec((None, H, bt, hd),
                                   lambda b, i, j: (b, 0, i, 0)),
            scratch_shapes=[
                pltpu.VMEM((H, bt, 1), jnp.float32),    # running max m
                pltpu.VMEM((H, bt, 1), jnp.float32),    # running sum l
                pltpu.VMEM((H, bt, hd), jnp.float32),   # output accumulator
            ],
        ),
        compiler_params=pltpu.CompilerParams(
            dimension_semantics=("parallel", "parallel", "arbitrary"),
            vmem_limit_bytes=_vmem_limit_bytes(),
        ),
    )(q, k, v)


# --------------------------------------------------------------------------
# c_proj with the head merge folded in: out(B,T,C) = sum_h y[:,h] @ Wp[h] + b
# Consumes y directly in (B, H, T, hd) layout -> no wrapper-side transpose.
# --------------------------------------------------------------------------
def _proj_heads_kernel(y_ref, w_ref, b_ref, o_ref, *, n_head):
    # y_ref: (H, tm, hd)   w_ref: (H, hd, tn)   b_ref: (1, tn)   o_ref: (tm, tn)
    acc = jnp.dot(y_ref[0], w_ref[0], preferred_element_type=jnp.float32)
    for h in range(1, n_head):
        acc = acc + jnp.dot(y_ref[h], w_ref[h],
                            preferred_element_type=jnp.float32)
    o_ref[...] = (acc + b_ref[...]).astype(o_ref.dtype)


def pallas_proj_merge_heads(y, w, b, *, out_dtype, tm=256, tn=1024):
    B, H, T, hd = y.shape
    Cin, N = w.shape
    assert Cin == H * hd and b.shape == (1, N)
    w3 = w.reshape(H, hd, N)   # column index of torch's c_proj input is h*hd+d
    tm = _pick_tile(T, tm)
    tn = _pick_tile(N, tn)
    kernel = functools.partial(_proj_heads_kernel, n_head=H)

    return pl.pallas_call(
        kernel,
        out_shape=jax.ShapeDtypeStruct((B, T, N), out_dtype),
        grid_spec=pltpu.PrefetchScalarGridSpec(
            num_scalar_prefetch=0,
            grid=(B, N // tn, T // tm),
            in_specs=[
                pl.BlockSpec((None, H, tm, hd), lambda bi, j, i: (bi, 0, i, 0)),
                pl.BlockSpec((H, hd, tn), lambda bi, j, i: (0, 0, j)),
                pl.BlockSpec((1, tn), lambda bi, j, i: (0, j)),
            ],
            out_specs=pl.BlockSpec((None, tm, tn), lambda bi, j, i: (bi, i, j)),
        ),
        compiler_params=pltpu.CompilerParams(
            dimension_semantics=("parallel", "parallel", "parallel"),
            vmem_limit_bytes=_vmem_limit_bytes(),
        ),
    )(y, w3, b)


# --------------------------------------------------------------------------
# CasualSelfAttention.forward
# --------------------------------------------------------------------------
def causal_self_attention(x, params, n_head, *, mm_dtype=jnp.float32,
                          block_t=256):
    """params = (wqkv, bqkv, wproj, bproj); weights pre-transposed to (in, out)
    so kernels compute h @ W + b (== torch.nn.Linear).  mm_dtype controls MXU
    operand precision; bfloat16 is recommended on all TPU generations
    (accumulation and softmax math stay f32)."""
    B, T, C = x.shape
    wqkv, bqkv, wproj, bproj = params
    assert C % n_head == 0
    hd = C // n_head
    scale = 1.0 / math.sqrt(hd)

    # Fold 1/sqrt(hd) into the Q slice of the c_attn weights (one-time, removes
    # a per-kv-step (H, bt, bt) multiply inside the flash kernel).
    wqkv_s = wqkv.at[:, :C].multiply(scale)
    bqkv_s = bqkv.at[:, :C].multiply(scale)

    # c_attn: (B*T, C) @ (C, 3C) + b — single fused K pass.
    x2d = x.reshape(B * T, C).astype(mm_dtype)
    qkv = pallas_linear(x2d, wqkv_s.astype(mm_dtype),
                        bqkv_s.astype(jnp.float32), out_dtype=mm_dtype)

    # Head split (one fused XLA slice+transpose pass; BlockSpec cannot permute
    # dims and an in-kernel head-major relayout would run on every kv step).
    qkv = qkv.reshape(B, T, 3, n_head, hd)
    q = qkv[:, :, 0].transpose(0, 2, 1, 3)          # (B, H, T, hd)
    k = qkv[:, :, 1].transpose(0, 2, 1, 3)
    v = qkv[:, :, 2].transpose(0, 2, 1, 3)

    y = flash_causal_attention(q, k, v, block_t=block_t,
                               approx_recip=(mm_dtype != jnp.float32))

    # c_proj consumes y in (B, H, T, hd) layout directly; head merge is folded
    # into the contraction, so no transpose / extra HBM round trip here.
    out = pallas_proj_merge_heads(y, wproj.astype(mm_dtype),
                                  bproj.astype(jnp.float32),
                                  out_dtype=jnp.float32)
    return out                                       # (B, T, C)


# --------------------------------------------------------------------------
# Plain-JAX reference (mirrors the PyTorch module) + test harness
# --------------------------------------------------------------------------
def attention_ref(x, params, n_head):
    wqkv, bqkv, wproj, bproj = params
    B, T, C = x.shape
    hd = C // n_head
    qkv = x @ wqkv + bqkv
    q, k, v = jnp.split(qkv, 3, axis=-1)
    q = q.reshape(B, T, n_head, hd).transpose(0, 2, 1, 3)
    k = k.reshape(B, T, n_head, hd).transpose(0, 2, 1, 3)
    v = v.reshape(B, T, n_head, hd).transpose(0, 2, 1, 3)
    att = jnp.einsum('bhqd,bhkd->bhqk', q, k) / math.sqrt(hd)
    mask = jnp.tril(jnp.ones((T, T), bool))
    att = jnp.where(mask, att, -jnp.inf)
    att = jax.nn.softmax(att, axis=-1)
    y = jnp.einsum('bhqk,bhkd->bhqd', att, v)
    y = y.transpose(0, 2, 1, 3).reshape(B, T, C)
    return y @ wproj + bproj


def init_params(key, C):
    ks = jax.random.split(key, 4)
    s = 0.02
    wqkv = s * jax.random.normal(ks[0], (C, 3 * C), jnp.float32)
    bqkv = s * jax.random.normal(ks[1], (1, 3 * C), jnp.float32)
    wproj = s * jax.random.normal(ks[2], (C, C), jnp.float32)
    bproj = s * jax.random.normal(ks[3], (1, C), jnp.float32)
    return wqkv, bqkv, wproj, bproj


if __name__ == "__main__":
    B, T, C, n_head = 2, 8, 32, 4
    key = jax.random.PRNGKey(0)
    kx, kp = jax.random.split(key)
    x = jax.random.normal(kx, (B, T, C), jnp.float32)
    params = init_params(kp, C)

    ref = attention_ref(x, params, n_head)

    # f32 MXU operands: tight parity with the PyTorch f32 module (exact 1/l).
    out_f32 = jax.block_until_ready(
        causal_self_attention(x, params, n_head, mm_dtype=jnp.float32))
    assert out_f32.shape == (B, T, C)
    err32 = jnp.max(jnp.abs(out_f32 - ref))
    assert jnp.allclose(out_f32, ref, atol=2e-3, rtol=2e-3), f"f32 err {err32}"

    # bf16 MXU operands (fast path on all generations); f32 accumulation.
    out_bf16 = jax.block_until_ready(
        causal_self_attention(x, params, n_head, mm_dtype=jnp.bfloat16))
    errbf = jnp.max(jnp.abs(out_bf16 - ref))
    assert jnp.allclose(out_bf16, ref, atol=3e-2, rtol=3e-2), f"bf16 err {errbf}"

    print("KERNEL_OK")
</pallas_src>

<mosaic_0001>
module attributes {stable_mosaic.version = 11 : i64} {
  func.func @_linear_kernel_fused(%arg0: i32, %arg1: i32, %arg2: memref<16x32xf32, #tpu.memory_space<vmem>>, %arg3: memref<32x96xf32, #tpu.memory_space<vmem>>, %arg4: memref<1x96xf32, #tpu.memory_space<vmem>>, %arg5: memref<16x96xf32, #tpu.memory_space<vmem>>) attributes {dimension_semantics = [#tpu.dimension_semantics<parallel>, #tpu.dimension_semantics<parallel>], iteration_bounds = array<i64: 1, 1>, scalar_prefetch = 0 : i64, scratch_operands = 0 : i64, tpu.core_type = #tpu.core_type<tc>, window_params = [{transform_indices = @transform_0, window_bounds = array<i64: 16, 32>}, {transform_indices = @transform_1, window_bounds = array<i64: 32, 96>}, {transform_indices = @transform_2, window_bounds = array<i64: 1, 96>}, {transform_indices = @transform_3, window_bounds = array<i64: 16, 96>}]} {
    %c0 = arith.constant 0 : index
    %c0_0 = arith.constant 0 : index
    %0 = vector.load %arg2[%c0, %c0_0] : memref<16x32xf32, #tpu.memory_space<vmem>>, vector<16x32xf32>
    %c0_1 = arith.constant 0 : index
    %c0_2 = arith.constant 0 : index
    %1 = vector.load %arg3[%c0_1, %c0_2] : memref<32x96xf32, #tpu.memory_space<vmem>>, vector<32x96xf32>
    %cst = arith.constant dense<0.000000e+00> : vector<16x96xf32>
    %2 = tpu.matmul %0, %1, %cst {dimension_numbers = #tpu.dot_dimension_numbers<[1], [0], [0], [1], [0, 0, 1, 1], [], []>} : vector<16x32xf32>, vector<32x96xf32>, vector<16x96xf32> -> vector<16x96xf32>
    %c0_3 = arith.constant 0 : index
    %c0_4 = arith.constant 0 : index
    %3 = vector.load %arg4[%c0_3, %c0_4] : memref<1x96xf32, #tpu.memory_space<vmem>>, vector<1x96xf32>
    %4 = vector.broadcast %3 : vector<1x96xf32> to vector<16x96xf32>
    %5 = arith.addf %2, %4 : vector<16x96xf32>
    %c0_5 = arith.constant 0 : index
    %c0_6 = arith.constant 0 : index
    %6 = vector.load %arg5[%c0_5, %c0_6] : memref<16x96xf32, #tpu.memory_space<vmem>>, vector<16x96xf32>
    tpu.vector_store %arg5[%c0_5, %c0_6], %5 {strides = array<i32>} : memref<16x96xf32, #tpu.memory_space<vmem>>, vector<16x96xf32>,
    return
  }
  func.func @transform_0(%arg0: i32, %arg1: i32) -> (i32, i32) {
    %c0_i32 = arith.constant 0 : i32
    %c0_i32_0 = arith.constant 0 : i32
    return %arg1, %c0_i32 : i32, i32
  }
  func.func @transform_1(%arg0: i32, %arg1: i32) -> (i32, i32) {
    %c0_i32 = arith.constant 0 : i32
    %c0_i32_0 = arith.constant 0 : i32
    return %c0_i32, %arg0 : i32, i32
  }
  func.func @transform_2(%arg0: i32, %arg1: i32) -> (i32, i32) {
    %c0_i32 = arith.constant 0 : i32
    %c0_i32_0 = arith.constant 0 : i32
    return %c0_i32, %arg0 : i32, i32
  }
  func.func @transform_3(%arg0: i32, %arg1: i32) -> (i32, i32) {
    %c0_i32 = arith.constant 0 : i32
    return %arg1, %arg0 : i32, i32
  }
}

</mosaic_0001>

<bundles_post_ra>
// kernel: tpu_custom_call.1
= control target key start
LH: loop header
LB: loop body
LE: loop exit
PB: predicated region body
PF: predicated region fallthrough
CT: control target
= control target key end

     0   :  { %8 = vsyncpa [#allocation3], 0  ;;  %s337_s0 = inlined_call_operand.hbm [shape: f32[16,32], index: 0, kind: input, shape index: {}]   ;;  %s338_s1 = inlined_call_operand.hbm [shape: f32[32,96], index: 1, kind: input, shape index: {}]   ;;  %s339_s2 = inlined_call_operand.vmem [shape: f32[1,96], index: 2, kind: input, shape index: {}]   ;;  %s340_s3 = inlined_call_operand.hbm [shape: f32[16,96], index: 3, kind: output, shape index: {}]  }
   0x1   :  { %9 = vsyncpa [#allocation6], 0 }
   0x2   :  { %10 = vsyncpa [#allocation4], 0  ;;  %s264_s12 = smov [#allocation2]   ;;  %s192_s16 = scalar_lea.hbm %s337_s0, 256 }
   0x3   :  { %s16_s13 = sshll.u32 %s264_s12, 4  ;;  %p193_p0 = scmp.ne.s32.totalorder %s337_s0, %s192_s16  ;;  %s17_s13 = int_to_ptr.vmem [resolvable:$true] %s16_s13 }
   0x4   :  { %p196_p1 = scmp.lt.u32.totalorder %s192_s16, %s337_s0 }
   0x6   :  { %p198_p2 = pnand %p196_p1, %p193_p0 }
   0x8   :  { %201 = shalt.err (!%p198_p2)
}
   0x9   :  { %s202_s21 = scalar_lea.vmem %s17_s13, 256  ;;  %p207_p4 = scmp.lt.s32.totalorder %s17_s13, %s17_s13 }
   0xa   :  { %p203_p3 = scmp.ne.s32.totalorder %s17_s13, %s202_s21  ;;  %p208_p5 = scmp.lt.s32.totalorder %s202_s21, %s202_s21 }
   0xc   :  { %p209_p6 = por %p208_p5, %p207_p4 }
   0xe   :  { %p210_p7 = pnand %p209_p6, %p203_p3 }
  0x10   :  { %213 = shalt.err (!%p210_p7)
}
  0x11   :  { %s265_s22 = smov 128   ;;  %s266_s23 = smov 8  }
  0x12   :  { %22 = dma.hbm_to_vmem [thread:$0]  %s337_s0, 256, %s17_s13, [#allocation3], %s265_s22, %s265_s22, %s266_s23  }
  0x13   :  { %s267_s26 = smov [#allocation5]   ;;  %s214_s30 = scalar_lea.hbm %s338_s1, 512 }
  0x14   :  { %s28_s27 = sshll.u32 %s267_s26, 4  ;;  %p215_p8 = scmp.ne.s32.totalorder %s338_s1, %s214_s30  ;;  %s29_s27 = int_to_ptr.vmem [resolvable:$true] %s28_s27 }
  0x15   :  { %p218_p9 = scmp.lt.u32.totalorder %s214_s30, %s338_s1 }
  0x17   :  { %p220_p10 = pnand %p218_p9, %p215_p8 }
  0x19   :  { %223 = shalt.err (!%p220_p10)
}
  0x1a   :  { %s224_s8 = scalar_lea.vmem %s29_s27, 512  ;;  %p229_p12 = scmp.lt.s32.totalorder %s29_s27, %s29_s27 }
  0x1b   :  { %p225_p11 = scmp.ne.s32.totalorder %s29_s27, %s224_s8  ;;  %p230_p13 = scmp.lt.s32.totalorder %s224_s8, %s224_s8 }
  0x1d   :  { %p231_p0 = por %p230_p13, %p229_p12 }
  0x1f   :  { %p232_p1 = pnand %p231_p0, %p225_p11 }
  0x21   :  { %235 = shalt.err (!%p232_p1)
}
  0x22   :  { %34 = dma.hbm_to_vmem [thread:$0]  %s338_s1, 512, %s29_s27, [#allocation6], %s265_s22, %s265_s22, %s266_s23  }
  0x23   :  { %258 = dma.done.wait [#allocation3], 256  }
  0x24   :  { %259 = vsyncadd [#allocation3], 4294967040 }
  0x25   :  { %260 = dma.done.wait [#allocation6], 512  }
  0x26   :  { %261 = vsyncadd [#allocation6], 4294966784  ;;  %vm56_vm0 = vcmask 261120   ;;  %v45_v0 = vld [vmem:[#allocation5] sm:$0xff]  ;;  %v46_v1 = vld [vmem:[#allocation5 + $0x8] sm:$0xff]  ;;  %s268_s11 = smov [#allocation7]  }
  0x27   :  { %v47_v2 = vld [vmem:[#allocation5 + $0x10] sm:$0xff]  ;;  %v179_v3 = vpack.c.bf16 %v46_v1, %v45_v0  ;;  %v48_v4 = vld [vmem:[#allocation5 + $0x18] sm:$0xff]  ;;  %s146_s12 = sshll.u32 %s268_s11, 4  ;;  %vm138_vm1 = vcmask 785408   ;;  %s147_s12 = int_to_ptr.vmem [resolvable:$true] %s146_s12 }
  0x28   :  { %v43_v5 = vld [vmem:[#allocation2] sm:$0xff]  ;;  %v183_v6 = vpack.c.bf16 %v48_v4, %v47_v2  ;;  %v44_v7 = vld [vmem:[#allocation2 + $0x8] sm:$0xff]  ;;  %s236_s13 = scalar_lea.vmem %s147_s12, 256  ;;  %p241_p3 = scmp.lt.s32.totalorder %s147_s12, %s147_s12 }
  0x29   :  { %176 = vmatprep.mubr.msk.f32.mxu0 %vm56_vm0, %v43_v5  ;;  %180 = vmatprep.subr.bf16.mxu0 %v179_v3  ;;  %v159_v8 = vld [vmem:[%s339_s2] ss:$0 sm:$0xff]  ;;  %p237_p2 = scmp.ne.s32.totalorder %s147_s12, %s236_s13  ;;  %p242_p4 = scmp.lt.s32.totalorder %s236_s13, %s236_s13 }
  0x2a   :  { %182 = vmatpush3.bf16.msra.mxu0 %v179_v3 }
  0x2b   :  { %184 = vmatprep.subr.bf16.mxu0 %v183_v6  ;;  %p243_p5 = por %p242_p4, %p241_p3 }
  0x2d   :  { %p244_p6 = pnand %p243_p5, %p237_p2 }
  0x2e   :  { %186 = vmatpush3.bf16.msra.mxu0 %v183_v6 }
  0x31   :  { %177 = vmatmul.mubr.msk.f32.vlgmr.msra.gmra.mrb[0].mxu0 %vm56_vm0, %v44_v7 }
 0x104   :  { %v178_v9 = vpop.f32.mrb[0].mxu0 }
 0x105   :  { %v135_v10 = vadd.f32 %v178_v9, %v159_v8  ;;  %v129_v11 = vpop.f32.mrb[1].mxu0 }
 0x106   :  { %v130_v12 = vadd.f32 %v159_v8, %v129_v11 }
 0x107   :  { %140 = vst.msk [vmem:[#allocation7 + $0x8] sm:$0xff] %vm138_vm1, %v135_v10 }
 0x108   :  { %139 = vst.msk [vmem:[#allocation7] sm:$0xff] %vm138_vm1, %v130_v12 }
 0x109   :  { %247 = shalt.err (!%p244_p6)
}
 0x10a   :  { %s248_s2 = scalar_lea.hbm %s340_s3, 256 }
 0x10b   :  { %p249_p7 = scmp.ne.s32.totalorder %s340_s3, %s248_s2  ;;  %p252_p8 = scmp.lt.u32.totalorder %s248_s2, %s340_s3 }
 0x10d   :  { %p254_p9 = pnand %p252_p8, %p249_p7 }
 0x10f   :  { %257 = shalt.err (!%p254_p9)
}
 0x110   :  { %152 = dma.vmem_to_hbm [thread:$0]  %s147_s12, 256, %s340_s3, [#allocation4], %s265_s22, %s265_s22, %s266_s23  }
 0x111   :  { %262 = dma.done.wait [#allocation4], 256  }
 0x112   :  { %263 = vsyncadd [#allocation4], 4294967040 }
 0x113   :  { %156 = vsyncpa [#allocation3], 1 }
 0x114   :  { %157 = vsyncpa [#allocation6], 1 }
 0x115   :  { %158 = vsyncpa [#allocation4], 1 }

</bundles_post_ra>
